<compile_context>
chip_gen: v6e
topology: v6e:2x2x1
jax: 0.10.0
libtpu: 0.0.40
codegen_flags: <defaults>
</compile_context>

<pallas_src>
import functools

import jax
import jax.numpy as jnp
from jax import lax
from jax.experimental import pallas as pl
from jax.experimental.pallas import tpu as pltpu

FACTOR = 8      # ConvNet.factor
KW = 5          # temporal kernel width of the ConvBlocks / conv2 window
EPS = 1e-5


# ----------------------------------------------------------------------------
# pltpu.roll convention probe (jnp.roll-like or the opposite direction).
# ----------------------------------------------------------------------------
_ROLL_MATCHES_JNP = None


def _roll_matches_jnp_roll():
    """True iff pltpu.roll(x, s, axis)[i] == x[i - s]  (i.e. jnp.roll semantics)."""
    global _ROLL_MATCHES_JNP
    if _ROLL_MATCHES_JNP is None:
        def k(x_ref, o_ref):
            o_ref[...] = pltpu.roll(x_ref[...], 1, axis=1)
        x = jnp.arange(8 * 128, dtype=jnp.float32).reshape(8, 128)
        y = pl.pallas_call(k, out_shape=jax.ShapeDtypeStruct((8, 128), jnp.float32))(x)
        _ROLL_MATCHES_JNP = bool(y[0, 1] == x[0, 0])
    return _ROLL_MATCHES_JNP


# ----------------------------------------------------------------------------
# Fused Pallas kernel: the whole forward pass in a single (grid-free) call.
# ----------------------------------------------------------------------------
def _convnet_fused_kernel(a0_ref, masks_ref,
                          w0_ref, b0_ref, w1_ref, bb1_ref, w2_ref, bb2_ref,
                          wc2_ref, bc2_ref,
                          pbig_ref, colmask_ref, liw_ref, lib_ref, q_ref,
                          mw1_ref, mb1_ref, mw2_ref, mb2_ref,
                          out_ref, *, shifts):
    f32 = jnp.float32
    bf16 = jnp.bfloat16

    masks = masks_ref[...]                         # (K, M) f32 tap-validity masks
    K, M = masks.shape
    rad = K // 2
    BL = colmask_ref.shape[1]                      # B * L (conv2 output columns)
    KH = M // BL                                   # conv2 kernel height (= input H)

    def taps(a):
        """K shifted copies of `a` along the flattened (h, b, l) lane axis, bf16.

        tap[t][:, m] = a[:, m + (t - rad)] with zero padding along l, realised
        as an XLU lane rotation plus a precomputed boundary mask (the centre
        tap skips both).  Cast to bf16 so the MXU sees native bf16 operands.
        """
        out = []
        for t in range(K):
            if t == rad:
                s = a
            else:
                s = pltpu.roll(a, shifts[t], axis=1) * masks[t:t + 1, :]
            out.append(s.astype(bf16))
        return out

    def conv_bn_relu(a, wref, b):
        # Grouped (1, K) conv for ALL channel groups at once: K accumulated
        # block-diagonal matmuls (no xcol concat), + folded BN bias + ReLU.
        ts = taps(a)
        acc = jnp.dot(wref[0], ts[0], preferred_element_type=f32)
        for t in range(1, K):
            acc = acc + jnp.dot(wref[t], ts[t], preferred_element_type=f32)
        return jnp.maximum(acc + b, 0.0)

    a0 = a0_ref[...]                                             # (C, M)   f32
    a1 = conv_bn_relu(a0, w0_ref, b0_ref[...])                   # (C1, M)
    a2 = conv_bn_relu(a1, w1_ref, bb1_ref[...]) + a1             # residual
    a3 = conv_bn_relu(a2, w2_ref, bb2_ref[...]) + a2

    # conv2: kernel (KH, K), groups=channels, collapses H; + norm2 + ReLU.
    # 25 accumulated block-diagonal matmuls over lane-aligned kh column slices.
    ts3 = taps(a3)                                               # K x (C1, M) bf16
    y2 = None
    for kw in range(K):
        tap = ts3[kw]
        for kh in range(KH):
            part = jnp.dot(wc2_ref[kh * K + kw],
                           tap[:, kh * BL:(kh + 1) * BL],
                           preferred_element_type=f32)
            y2 = part if y2 is None else y2 + part
    y2 = jnp.maximum(y2 + bc2_ref[...], 0.0)                     # (C2, BL)

    # Head: factor-mean -> Linear(seq_len, node_dim) -> ReLU -> channel-mean -> MLP.
    xf = jnp.dot(pbig_ref[...], y2, preferred_element_type=f32) * colmask_ref[...]
    h1 = jnp.maximum(
        jnp.dot(xf, liw_ref[...], preferred_element_type=f32) + lib_ref[...], 0.0)
    gm = jnp.dot(q_ref[...], h1, preferred_element_type=f32)     # (B, node_dim)
    z = jnp.maximum(
        jnp.dot(gm, mw1_ref[...], preferred_element_type=f32) + mb1_ref[...], 0.0)
    out_ref[...] = jnp.dot(z, mw2_ref[...], preferred_element_type=f32) + mb2_ref[...]


# ----------------------------------------------------------------------------
# Parameter construction / folding (all outside the kernel, build-time only).
# ----------------------------------------------------------------------------
def init_raw_params(key, channels=19, window_size=5, seq_len=64, node_dim=128,
                    hidden=64, class_num=3):
    ks = iter(jax.random.split(key, 32))

    def nrm(shape, fan_in):
        return jax.random.normal(next(ks), shape, jnp.float32) / jnp.sqrt(fan_in)

    def bn(n):
        return dict(
            gamma=1.0 + 0.1 * jax.random.normal(next(ks), (n,), jnp.float32),
            beta=0.1 * jax.random.normal(next(ks), (n,), jnp.float32),
            mean=0.1 * jax.random.normal(next(ks), (n,), jnp.float32),
            var=jax.random.uniform(next(ks), (n,), jnp.float32, minval=0.5, maxval=1.5),
        )

    blocks = []
    in_pg = 1
    for _ in range(3):
        cout = FACTOR * channels
        w = nrm((cout, in_pg, 1, KW), in_pg * KW)
        b = 0.1 * jax.random.normal(next(ks), (cout,), jnp.float32)
        blocks.append(dict(w=w, b=b, **bn(cout)))
        in_pg = FACTOR
    c2out = 2 * FACTOR * channels
    conv2 = dict(
        w=nrm((c2out, FACTOR, 5, window_size), FACTOR * 5 * window_size),
        b=0.1 * jax.random.normal(next(ks), (c2out,), jnp.float32),
        **bn(c2out))
    return dict(
        channels=channels, window_size=window_size, blocks=blocks, conv2=conv2,
        li_w=nrm((node_dim, seq_len), seq_len),
        li_b=0.1 * jax.random.normal(next(ks), (node_dim,), jnp.float32),
        w1=nrm((hidden, node_dim), node_dim),
        b1=0.1 * jax.random.normal(next(ks), (hidden,), jnp.float32),
        w2=nrm((class_num, hidden), hidden),
        b2=0.1 * jax.random.normal(next(ks), (class_num,), jnp.float32),
    )


def _fold_bn(conv_bias, bn_params):
    sc = bn_params["gamma"] / jnp.sqrt(bn_params["var"] + EPS)
    sh = bn_params["beta"] - bn_params["mean"] * sc
    return sc, sc * conv_bias + sh


def build_kernel_params(raw, batch):
    """Fold BN into the weights, expand block-diagonal matrices, build head constants."""
    ch = raw["channels"]
    K = KW
    rad = K // 2
    L = raw["li_w"].shape[1]                     # seq_len
    KH = raw["conv2"]["w"].shape[2]              # conv2 kernel height (= input H)
    H = KH
    B = batch
    blocks = raw["blocks"]
    OPG = FACTOR
    bf16 = jnp.bfloat16

    def expand(w_slice, out_pg, in_pg):
        # (C_out, in_pg) -> (C_out, ch*in_pg) block-diagonal; group g = row // out_pg.
        c_out = w_slice.shape[0]
        g = jnp.arange(c_out) // out_pg
        cols = jnp.arange(ch * in_pg)
        sel = (cols[None, :] // in_pg) == g[:, None]
        off = jnp.clip(cols[None, :] - (g * in_pg)[:, None], 0, in_pg - 1)
        return jnp.where(sel, jnp.take_along_axis(w_slice, off, axis=1), 0.0)

    # Block 0 (in_pg = 1).
    sc0, bias0 = _fold_bn(blocks[0]["b"], blocks[0])
    w0 = blocks[0]["w"][:, :, 0, :] * sc0[:, None, None]          # (C1, 1, K)
    W0 = jnp.stack([expand(w0[:, :, t], OPG, 1) for t in range(K)], 0)   # (K, C1, ch)
    b0 = bias0[:, None]

    def blk(bl):
        sc, bias = _fold_bn(bl["b"], bl)
        w = bl["w"][:, :, 0, :] * sc[:, None, None]               # (C1, 8, K)
        W = jnp.stack([expand(w[:, :, t], OPG, OPG) for t in range(K)], 0)  # (K, C1, C1)
        return W, bias[:, None]

    W1, bb1 = blk(blocks[1])
    W2, bb2 = blk(blocks[2])

    sc2, bias2 = _fold_bn(raw["conv2"]["b"], raw["conv2"])
    w2c = raw["conv2"]["w"] * sc2[:, None, None, None]            # (C2, 8, KH, K)
    WC2 = jnp.stack([expand(w2c[:, :, kh, kw], 2 * OPG, OPG)
                     for kh in range(KH) for kw in range(K)], 0)  # (KH*K, C2, C1)
    bc2 = bias2[:, None]

    C2 = w2c.shape[0]
    ffac = C2 // ch                                               # 2 * FACTOR
    M = H * B * L
    BL = B * L

    # Tap validity masks (zero padding of the 1-D conv along l; l is innermost).
    m_idx = jnp.arange(M, dtype=jnp.int32) % L
    masks = jnp.stack(
        [((m_idx + (t - rad) >= 0) & (m_idx + (t - rad) < L)) for t in range(K)],
        axis=0).astype(jnp.float32)                               # (K, M)

    # Head constants (factor-mean, per-batch column select, tiled Linear, channel-mean).
    c_idx = jnp.arange(C2)
    row_idx = jnp.arange(B * ch)
    pbig = (c_idx[None, :] % ch == row_idx[:, None] % ch).astype(jnp.float32) / ffac
    m2_idx = jnp.arange(BL)
    colmask = (m2_idx[None, :] // L == row_idx[:, None] // ch).astype(jnp.float32)
    li_tiled = jnp.tile(raw["li_w"].T, (B, 1))                    # (B*L, node_dim)
    li_b = raw["li_b"][None, :]
    q = (row_idx[None, :] // ch == jnp.arange(B)[:, None]).astype(jnp.float32) / ch

    return dict(W0=W0.astype(bf16), b0=b0, W1=W1.astype(bf16), bb1=bb1,
                W2=W2.astype(bf16), bb2=bb2, WC2=WC2.astype(bf16), bc2=bc2,
                masks=masks,
                pbig=pbig, colmask=colmask, li_tiled=li_tiled, li_b=li_b, q=q,
                w1T=raw["w1"].T, b1=raw["b1"][None, :],
                w2T=raw["w2"].T, b2=raw["b2"][None, :])


# ----------------------------------------------------------------------------
# Forward pass: a single grid-free pallas_call (everything resident in VMEM).
# ----------------------------------------------------------------------------
def convnet_forward_pallas(x_nchw, p):
    B, C, H, L = x_nchw.shape
    K, M = p["masks"].shape
    BL = p["colmask"].shape[1]
    assert M == H * B * L and BL == B * L
    class_num = p["w2T"].shape[1]
    rad = K // 2

    # Channel-major activation with the flattened (h, b, l) axis on lanes.
    a0 = jnp.transpose(x_nchw, (1, 2, 0, 3)).astype(jnp.float32).reshape(C, M)

    # Static rotate amounts so tap t holds a[:, m + (t - rad)] regardless of
    # the pltpu.roll direction convention.
    like_jnp = _roll_matches_jnp_roll()
    shifts = tuple(((rad - t) % M) if like_jnp else ((t - rad) % M) for t in range(K))
    kernel = functools.partial(_convnet_fused_kernel, shifts=shifts)

    return pl.pallas_call(
        kernel,
        out_shape=jax.ShapeDtypeStruct((B, class_num), jnp.float32),
    )(a0, p["masks"], p["W0"], p["b0"], p["W1"], p["bb1"], p["W2"], p["bb2"],
      p["WC2"], p["bc2"], p["pbig"], p["colmask"], p["li_tiled"], p["li_b"],
      p["q"], p["w1T"], p["b1"], p["w2T"], p["b2"])


# ----------------------------------------------------------------------------
# Pure-JAX reference (same semantics as the PyTorch forward, eval-mode BN)
# ----------------------------------------------------------------------------
def reference_forward(x, raw):
    ch = raw["channels"]
    hp = lax.Precision.HIGHEST
    h = x.astype(jnp.float32)
    for i, bl in enumerate(raw["blocks"]):
        y = lax.conv_general_dilated(
            h, bl["w"], window_strides=(1, 1), padding=((0, 0), (2, 2)),
            dimension_numbers=("NCHW", "OIHW", "NCHW"),
            feature_group_count=ch, precision=hp)
        y = y + bl["b"][None, :, None, None]
        sc = bl["gamma"] / jnp.sqrt(bl["var"] + EPS)
        sh = bl["beta"] - bl["mean"] * sc
        y = jnp.maximum(y * sc[None, :, None, None] + sh[None, :, None, None], 0.0)
        h = y if i == 0 else y + h
    c2 = raw["conv2"]
    y = lax.conv_general_dilated(
        h, c2["w"], window_strides=(1, 1), padding=((0, 0), (2, 2)),
        dimension_numbers=("NCHW", "OIHW", "NCHW"),
        feature_group_count=ch, precision=hp)
    y = (y + c2["b"][None, :, None, None])[:, :, 0, :]            # (B, C2, L)
    sc = c2["gamma"] / jnp.sqrt(c2["var"] + EPS)
    sh = c2["beta"] - c2["mean"] * sc
    y = jnp.maximum(y * sc[None, :, None] + sh[None, :, None], 0.0)
    bsz, c2n, l = y.shape
    y = y.reshape(bsz, 2 * FACTOR, ch, l).mean(axis=1)            # (B, ch, L)
    y = jnp.maximum(jnp.einsum("bcl,nl->bcn", y, raw["li_w"], precision=hp)
                    + raw["li_b"], 0.0)                           # (B, ch, node_dim)
    y = y.mean(axis=1)                                            # (B, node_dim)
    y = jnp.maximum(jnp.dot(y, raw["w1"].T, precision=hp) + raw["b1"], 0.0)
    return jnp.dot(y, raw["w2"].T, precision=hp) + raw["b2"]      # (B, class_num)


if __name__ == "__main__":
    key = jax.random.PRNGKey(0)
    # channels must be 19 (the module hard-codes .view(B, 16, 19, L)); H must be
    # 5 (conv2 kernel height); B*L chosen so the lane axes are 128-multiples.
    B, C, H, L = 2, 19, 5, 64
    node_dim, hidden, class_num = 128, 64, 3

    kx, kp = jax.random.split(key)
    x = jax.random.normal(kx, (B, C, H, L), jnp.float32)
    raw = init_raw_params(kp, channels=C, window_size=5, seq_len=L,
                          node_dim=node_dim, hidden=hidden, class_num=class_num)
    kparams = build_kernel_params(raw, batch=B)

    out = jax.block_until_ready(convnet_forward_pallas(x, kparams))

    ref = reference_forward(x, raw)
    assert out.shape == (B, class_num)
    assert bool(jnp.all(jnp.isfinite(out)))
    max_err = float(jnp.max(jnp.abs(out - ref)))
    assert bool(jnp.allclose(out, ref, rtol=2e-2, atol=2e-2)), f"max abs diff {max_err}"
    print("KERNEL_OK")
</pallas_src>

<mosaic_0001>
module attributes {stable_mosaic.version = 11 : i64} {
  func.func @k(%arg0: memref<8x128xf32, #tpu.memory_space<vmem>>, %arg1: memref<8x128xf32, #tpu.memory_space<vmem>>) attributes {dimension_semantics = [], scalar_prefetch = 0 : i64, scratch_operands = 0 : i64, tpu.core_type = #tpu.core_type<tc>} {
    %c0 = arith.constant 0 : index
    %c0_0 = arith.constant 0 : index
    %0 = vector.load %arg0[%c0, %c0_0] : memref<8x128xf32, #tpu.memory_space<vmem>>, vector<8x128xf32>
    %c1_i32 = arith.constant 1 : i32
    %1 = tpu.dynamic_rotate %0 by %c1_i32 dim 1 : vector<8x128xf32>, i32 -> vector<8x128xf32>
    %c0_1 = arith.constant 0 : index
    %c0_2 = arith.constant 0 : index
    %2 = vector.load %arg1[%c0_1, %c0_2] : memref<8x128xf32, #tpu.memory_space<vmem>>, vector<8x128xf32>
    tpu.vector_store %arg1[%c0_1, %c0_2], %1 {strides = array<i32>} : memref<8x128xf32, #tpu.memory_space<vmem>>, vector<8x128xf32>,
    return
  }
}

</mosaic_0001>

<bundles_post_ra>
// kernel: tpu_custom_call.1
= control target key start
LH: loop header
LB: loop body
LE: loop exit
PB: predicated region body
PF: predicated region fallthrough
CT: control target
= control target key end

     0   :  { %6 = vsyncpa [#allocation3], 0  ;;  %s106_s0 = inlined_call_operand.hbm [shape: f32[8,128], index: 0, kind: input, shape index: {}]   ;;  %s107_s1 = inlined_call_operand.hbm [shape: f32[8,128], index: 1, kind: output, shape index: {}]  }
   0x1   :  { %7 = vsyncpa [#allocation4], 0  ;;  %s87_s6 = smov [#allocation2]  }
   0x2   :  { %s14_s7 = sshll.u32 %s87_s6, 4  ;;  %s15_s7 = int_to_ptr.vmem [resolvable:$true] %s14_s7 }
   0x3   :  { %s51_s8 = scalar_lea.vmem %s15_s7, 128  ;;  %p56_p1 = scmp.lt.s32.totalorder %s15_s7, %s15_s7 }
   0x4   :  { %p52_p0 = scmp.ne.s32.totalorder %s15_s7, %s51_s8  ;;  %p57_p2 = scmp.lt.s32.totalorder %s51_s8, %s51_s8 }
   0x6   :  { %p58_p3 = por %p57_p2, %p56_p1 }
   0x8   :  { %p59_p4 = pnand %p58_p3, %p52_p0 }
   0xa   :  { %62 = shalt.err (!%p59_p4)
}
   0xb   :  { %17 = dma.hbm_to_vmem [thread:$0]  %s106_s0, 128, %s15_s7, [#allocation3]  }
   0xc   :  { %83 = dma.done.wait [#allocation3], 128  }
   0xd   :  { %84 = vsyncadd [#allocation3], 4294967168  ;;  %v21_v0 = vld [vmem:[#allocation2] sm:$0xff]  ;;  %s88_s11 = smov 1   ;;  %s89_s12 = smov [#allocation5]  }
   0xe   :  { %22 = vrot.lane.b32.xlu0 %v21_v0, %s88_s11  ;;  %s31_s13 = sshll.u32 %s89_s12, 4  ;;  %s32_s13 = int_to_ptr.vmem [resolvable:$true] %s31_s13 }
   0xf   :  { %s63_s14 = scalar_lea.vmem %s32_s13, 128  ;;  %p68_p6 = scmp.lt.s32.totalorder %s32_s13, %s32_s13 }
  0x10   :  { %p64_p5 = scmp.ne.s32.totalorder %s32_s13, %s63_s14  ;;  %p69_p7 = scmp.lt.s32.totalorder %s63_s14, %s63_s14 }
  0x12   :  { %p70_p8 = por %p69_p7, %p68_p6 }
  0x14   :  { %p71_p9 = pnand %p70_p8, %p64_p5 }
  0x80   :  { %v23_v1 = vpop.permute.xlu0 %22 }
  0x81   :  { %24 = vst [vmem:[#allocation5] sm:$0xff] %v23_v1 }
  0x82   :  { %74 = shalt.err (!%p71_p9)
}
  0x83   :  { %34 = dma.vmem_to_hbm [thread:$0]  %s32_s13, 128, %s107_s1, [#allocation4]  }
  0x84   :  { %85 = dma.done.wait [#allocation4], 128  }
  0x85   :  { %86 = vsyncadd [#allocation4], 4294967168 }
  0x86   :  { %38 = vsyncpa [#allocation3], 1 }
  0x87   :  { %39 = vsyncpa [#allocation4], 1 }

</bundles_post_ra>
